<compile_context>
chip_gen: v5e
topology: v5e:2x2
jax: 0.10.0
libtpu: 0.0.40
codegen_flags: <defaults>
</compile_context>

<pallas_src>
import functools

import numpy as np
import jax
import jax.numpy as jnp
from jax.experimental import pallas as pl
from jax.experimental.pallas import tpu as pltpu


def _vmem_budget(est_bytes):
    """Explicit per-call VMEM limit: generous headroom, safe on v7x's 64 MiB."""
    return int(min(max(4 * est_bytes, 8 << 20), 48 << 20))


# ------------------------------------------------------------------
# Pallas kernels
# ------------------------------------------------------------------

def _conv_kernel(*refs, kh, kw, cin, ho, wo, pad, s2d, cin0, oh, ow,
                 prologue, add_res, emit_stats):
    """Stride-1 valid conv on a pre-padded NHWC image; one batch item per grid step.

    Single MXU matmul per step: a bf16 im2col patch (Ho*Wo, kh*kw*cin) is assembled in a
    VMEM scratch and multiplied with the pre-flattened (kh*kw*cin, Cout) weight.  Fused:
    per-input-channel BN+ReLU prologue (applied once, halo re-zeroed by masks -- also in
    space-to-depth coordinates for strided convs), residual add, and per-output-channel
    (sum, sumsq) partial statistics for the next BatchNorm.  Accumulation is f32.
    """
    it = iter(refs)
    x_ref = next(it)                       # (1, Hp, Wp, cin)   bf16
    w_ref = next(it)                       # (kh*kw*cin, Cout)  bf16
    if prologue:
        sc_ref = next(it)                  # (1, cin) f32
        sh_ref = next(it)                  # (1, cin) f32
    if add_res:
        res_ref = next(it)                 # (1, Ho*Wo, Cout) bf16
    out_ref = next(it)                     # (1, Ho*Wo, Cout) bf16
    if emit_stats:
        st_ref = next(it)                  # (1, 2, Cout) f32

    hp = x_ref.shape[1]
    wp = x_ref.shape[2]
    direct = (kh == 1 and kw == 1 and (not prologue) and hp == ho and wp == wo)

    if prologue:
        act_ref = next(it)                 # scratch (Hp, Wp, cin) bf16
    if not direct:
        col_ref = next(it)                 # scratch (Ho, Wo, kh*kw*cin) bf16

    if prologue:
        # BN+ReLU pre-activation applied once; zero halo re-established post-affine.
        a = jnp.maximum(
            x_ref[0].astype(jnp.float32) * sc_ref[...][None] + sh_ref[...][None], 0.0)
        if pad > 0:
            r = jax.lax.broadcasted_iota(jnp.int32, (hp, 1, 1), 0)
            c = jax.lax.broadcasted_iota(jnp.int32, (1, wp, 1), 1)
            if s2d:
                # channel index = (dh*2+dw)*cin0 + c0  ->  original coords (2r+dh, 2c+dw)
                g = jax.lax.broadcasted_iota(jnp.int32, (1, 1, cin), 2) // cin0
                ro = 2 * r + g // 2
                co = 2 * c + g % 2
                valid = ((ro >= pad) & (ro < oh + pad) &
                         (co >= pad) & (co < ow + pad))
            else:
                valid = ((r >= pad) & (r < hp - pad) &
                         (c >= pad) & (c < wp - pad))
            a = jnp.where(valid, a, 0.0)
        act_ref[...] = a.astype(jnp.bfloat16)

    if direct:
        patch = x_ref[0].reshape(ho * wo, cin).astype(jnp.bfloat16)
    else:
        # im2col into VMEM (bf16); taps sliced from the activated scratch / input ref.
        for i in range(kh):
            for j in range(kw):
                t = (i * kw + j) * cin
                if prologue:
                    tap = act_ref[i:i + ho, j:j + wo, :]
                else:
                    tap = x_ref[0, i:i + ho, j:j + wo, :]
                col_ref[:, :, t:t + cin] = tap.astype(jnp.bfloat16)
        patch = col_ref[...].reshape(ho * wo, kh * kw * cin)

    acc = jnp.dot(patch, w_ref[...], preferred_element_type=jnp.float32)
    if add_res:
        acc = acc + res_ref[0].astype(jnp.float32)      # fused residual add
    out_ref[0] = acc.astype(out_ref.dtype)
    if emit_stats:
        s = jnp.sum(acc, axis=0, keepdims=True)
        ss = jnp.sum(acc * acc, axis=0, keepdims=True)
        st_ref[0] = jnp.concatenate([s, ss], axis=0)


def _apply_kernel(x_ref, sc_ref, sh_ref, y_ref, st_ref, *, relu):
    """Lane-dense elementwise affine (+ReLU) with fused (sum, sumsq) partial stats."""
    x = x_ref[...].astype(jnp.float32)
    y = x * sc_ref[...] + sh_ref[...]
    if relu:
        y = jnp.maximum(y, 0.0)
    y_ref[...] = y.astype(y_ref.dtype)
    s = jnp.sum(y, axis=0, keepdims=True)
    ss = jnp.sum(y * y, axis=0, keepdims=True)
    st_ref[0] = jnp.concatenate([s, ss], axis=0)


def _rowstats_kernel(x_ref, st_ref):
    """Stats-only pass: per-row (sum, sumsq); nothing else is written back to HBM."""
    x = x_ref[...].astype(jnp.float32)
    s = jnp.sum(x, axis=1, keepdims=True)
    ss = jnp.sum(x * x, axis=1, keepdims=True)
    st_ref[...] = jnp.concatenate([s, ss], axis=1)


def _wavelet_kernel(x_ref, rsc_ref, rsh_ref, fr_ref, fi_ref, o_ref):
    """Standardize-BN prologue (per-row affine) + Morlet filter-bank column block + |W|^2."""
    a = (x_ref[...].astype(jnp.float32) * rsc_ref[...] + rsh_ref[...]).astype(jnp.bfloat16)
    wr = jnp.dot(a, fr_ref[...], preferred_element_type=jnp.float32)
    wi = jnp.dot(a, fi_ref[...], preferred_element_type=jnp.float32)
    o_ref[...] = (wr * wr + wi * wi).astype(o_ref.dtype)


def _head_kernel(x_ref, w_ref, b_ref, o_ref):
    """AdaptiveAvgPool2d(1) + Flatten + Linear, fused."""
    pooled = jnp.mean(x_ref[...].astype(jnp.float32), axis=1)      # (N, C)
    o_ref[...] = jnp.dot(pooled, w_ref[...],
                         preferred_element_type=jnp.float32) + b_ref[...]


# ------------------------------------------------------------------
# Kernel wrappers
# ------------------------------------------------------------------

def bn_scale_shift(stat, gamma, beta, count, eps=1e-5):
    """Finalize BN batch stats (biased) into per-channel scale/shift (tiny O(C) glue)."""
    C = stat.shape[-1]
    s = stat.reshape(-1, 2, C).sum(axis=0)
    mean = s[0] / count
    var = jnp.maximum(s[1] / count - mean * mean, 0.0)          # clamp: no negative var
    scale = gamma * jax.lax.rsqrt(var + eps)
    shift = beta - mean * scale
    return scale, shift


def row_stats(x2):
    """Per-row (sum, sumsq) of a (rows, L) tensor; stats-only, no copy written."""
    R, L = x2.shape
    return pl.pallas_call(
        _rowstats_kernel,
        out_shape=jax.ShapeDtypeStruct((R, 2), jnp.float32),
        compiler_params=pltpu.CompilerParams(
            vmem_limit_bytes=_vmem_budget(R * L * 8)),
    )(x2)


def bn_apply(x2d, scale, shift, *, relu, out_dtype=jnp.bfloat16):
    """Affine (+ReLU) over a (rows, C) tensor, lane-dense, row-tiled; returns (y, stats)."""
    rows0, C = x2d.shape
    total = rows0 * C
    if total % 128 == 0 and 128 % C == 0:
        G = 128 // C
        cw = 128
        xd = x2d.reshape(total // 128, 128)
        sc = jnp.tile(scale, G).reshape(1, 128)
        sh = jnp.tile(shift, G).reshape(1, 128)
    else:
        G = 1
        cw = C
        xd = x2d
        sc = scale.reshape(1, C)
        sh = shift.reshape(1, C)
    R = xd.shape[0]
    if R > 2048:
        TR = next((d for d in range(2048, 7, -8) if R % d == 0), R)
    else:
        TR = R
    T = R // TR

    est = (TR * cw * (xd.dtype.itemsize + 2 + 4) + 2 * cw * 4) * 2
    kern = functools.partial(_apply_kernel, relu=relu)
    y, st = pl.pallas_call(
        kern,
        out_shape=(jax.ShapeDtypeStruct((R, cw), out_dtype),
                   jax.ShapeDtypeStruct((T, 2, cw), jnp.float32)),
        grid=(T,),
        in_specs=[pl.BlockSpec((TR, cw), lambda t: (t, 0)),
                  pl.BlockSpec((1, cw), lambda t: (0, 0)),
                  pl.BlockSpec((1, cw), lambda t: (0, 0))],
        out_specs=[pl.BlockSpec((TR, cw), lambda t: (t, 0)),
                   pl.BlockSpec((1, 2, cw), lambda t: (t, 0, 0))],
        compiler_params=pltpu.CompilerParams(
            dimension_semantics=("parallel",),
            vmem_limit_bytes=_vmem_budget(est)),
    )(xd, sc, sh)

    stat = st.sum(axis=0)                                       # (2, cw)
    if G > 1:
        stat = stat.reshape(2, G, C).sum(axis=1)                # fold lane groups -> (2, C)
    return y.reshape(rows0, C), stat


def space_to_depth(x):
    """NHWC space-to-depth by 2 (pads H/W to even); channel order (dh, dw, c)."""
    N, Hp, Wp, C = x.shape
    x = jnp.pad(x, ((0, 0), (0, Hp % 2), (0, Wp % 2), (0, 0)))
    H2, W2 = (Hp + 1) // 2, (Wp + 1) // 2
    x = x.reshape(N, H2, 2, W2, 2, C).transpose(0, 1, 3, 2, 4, 5)
    return x.reshape(N, H2, W2, 4 * C)


def conv2d(x_flat, hw, wk, meta, *, ksize, stride, pad, prologue=None, res=None,
           emit_stats=True, out_dtype=jnp.bfloat16):
    """Conv2d(bias=False) with optional fused BN+ReLU prologue / residual add / stats.

    x_flat: (N, H*W, Cin) bf16; returns (y (N, Ho*Wo, Cout) bf16, stats (N, 2, Cout) | None,
    (Ho, Wo)).  Strided convs run as stride-1 convs on a space-to-depth repacked input
    (weights repacked once at init).
    """
    N, _, Cin0 = x_flat.shape
    H, W = hw
    x = x_flat.reshape(N, H, W, Cin0)
    if pad:
        x = jnp.pad(x, ((0, 0), (pad, pad), (pad, pad), (0, 0)))
    s2d = (stride == 2)
    if s2d:
        x = space_to_depth(x)
    Ho = (H + 2 * pad - ksize) // stride + 1
    Wo = (W + 2 * pad - ksize) // stride + 1
    kh, kw, cin = meta['kh'], meta['kw'], meta['cin']
    K, Cout = wk.shape
    Hp, Wp = x.shape[1], x.shape[2]
    assert K == kh * kw * cin and x.shape[3] == cin
    assert Hp >= Ho + kh - 1 and Wp >= Wo + kw - 1

    has_pro = prologue is not None
    has_res = res is not None
    direct = (kh == 1 and kw == 1 and (not has_pro) and Hp == Ho and Wp == Wo)

    kern = functools.partial(
        _conv_kernel, kh=kh, kw=kw, cin=cin, ho=Ho, wo=Wo,
        pad=(pad if has_pro else 0), s2d=s2d, cin0=Cin0, oh=H, ow=W,
        prologue=has_pro, add_res=has_res, emit_stats=emit_stats)

    in_arrays = [x, wk]
    in_specs = [pl.BlockSpec((1, Hp, Wp, cin), lambda n: (n, 0, 0, 0)),
                pl.BlockSpec((K, Cout), lambda n: (0, 0))]
    if has_pro:
        sc, sh = prologue
        if s2d:
            sc = jnp.tile(sc, 4)          # (dh, dw, c) channel packing
            sh = jnp.tile(sh, 4)
        in_arrays += [sc.reshape(1, cin).astype(jnp.float32),
                      sh.reshape(1, cin).astype(jnp.float32)]
        in_specs += [pl.BlockSpec((1, cin), lambda n: (0, 0)),
                     pl.BlockSpec((1, cin), lambda n: (0, 0))]
    if has_res:
        in_arrays.append(res)
        in_specs.append(pl.BlockSpec((1, Ho * Wo, Cout), lambda n: (n, 0, 0)))

    out_shape = [jax.ShapeDtypeStruct((N, Ho * Wo, Cout), out_dtype)]
    out_specs = [pl.BlockSpec((1, Ho * Wo, Cout), lambda n: (n, 0, 0))]
    if emit_stats:
        out_shape.append(jax.ShapeDtypeStruct((N, 2, Cout), jnp.float32))
        out_specs.append(pl.BlockSpec((1, 2, Cout), lambda n: (n, 0, 0)))

    scratch = []
    if has_pro:
        scratch.append(pltpu.VMEM((Hp, Wp, cin), jnp.bfloat16))
    if not direct:
        scratch.append(pltpu.VMEM((Ho, Wo, K), jnp.bfloat16))

    est = (Hp * Wp * cin * (x.dtype.itemsize + 2) + K * Cout * 2
           + Ho * Wo * Cout * (2 + (2 if has_res else 0) + 4)
           + Ho * Wo * K * 2) * 2
    outs = pl.pallas_call(
        kern,
        out_shape=tuple(out_shape),
        grid=(N,),
        in_specs=in_specs,
        out_specs=tuple(out_specs),
        scratch_shapes=scratch,
        compiler_params=pltpu.CompilerParams(
            dimension_semantics=("parallel",),
            vmem_limit_bytes=_vmem_budget(est)),
    )(*in_arrays)

    if emit_stats:
        y, st = outs
    else:
        y = outs[0] if isinstance(outs, (tuple, list)) else outs
        st = None
    return y, st, (Ho, Wo)


def wavelet_power(x2, row_sc, row_sh, filt_r, filt_i, col_tile):
    """Standardize prologue + Morlet filter bank + |W|^2; gridded over filter columns."""
    NC, L = x2.shape
    SPp = filt_r.shape[1]
    T = SPp // col_tile
    est = (NC * L * 4 + 2 * L * col_tile * 2 + NC * col_tile * 2) * 2
    return pl.pallas_call(
        _wavelet_kernel,
        out_shape=jax.ShapeDtypeStruct((NC, SPp), jnp.bfloat16),
        grid=(T,),
        in_specs=[pl.BlockSpec((NC, L), lambda t: (0, 0)),
                  pl.BlockSpec((NC, 1), lambda t: (0, 0)),
                  pl.BlockSpec((NC, 1), lambda t: (0, 0)),
                  pl.BlockSpec((L, col_tile), lambda t: (0, t)),
                  pl.BlockSpec((L, col_tile), lambda t: (0, t))],
        out_specs=pl.BlockSpec((NC, col_tile), lambda t: (0, t)),
        compiler_params=pltpu.CompilerParams(
            dimension_semantics=("parallel",),
            vmem_limit_bytes=_vmem_budget(est)),
    )(x2, row_sc, row_sh, filt_r, filt_i)


def head(h_flat, fc_wT, fc_b):
    N = h_flat.shape[0]
    K = fc_wT.shape[1]
    return pl.pallas_call(
        _head_kernel,
        out_shape=jax.ShapeDtypeStruct((N, K), jnp.float32),
    )(h_flat, fc_wT, fc_b)


# ------------------------------------------------------------------
# Weight packing (hoisted to init) and wavelet filter bank
# ------------------------------------------------------------------

def pack_conv(w_oihw, stride):
    """OIHW -> flattened (kh_eff*kw_eff*Cin_eff, Cout) bf16, s2d-packed for stride 2."""
    Cout, Cin, kh, kw = w_oihw.shape
    whwio = jnp.transpose(w_oihw, (2, 3, 1, 0))                 # (kh, kw, Cin, Cout)
    if stride == 1:
        kh_e, kw_e, cin_e = kh, kw, Cin
        wk = whwio
    else:
        kh2, kw2 = (kh + 1) // 2, (kw + 1) // 2
        wp = jnp.zeros((kh2 * 2, kw2 * 2, Cin, Cout), jnp.float32).at[:kh, :kw].set(whwio)
        wp = wp.reshape(kh2, 2, kw2, 2, Cin, Cout).transpose(0, 2, 1, 3, 4, 5)
        wk = wp.reshape(kh2, kw2, 4 * Cin, Cout)
        kh_e, kw_e, cin_e = kh2, kw2, 4 * Cin
    wk = wk.reshape(kh_e * kw_e * cin_e, Cout).astype(jnp.bfloat16)
    return wk, dict(kh=kh_e, kw=kw_e, cin=cin_e)


_W0 = 6.0  # Morlet central frequency


def morlet_filter_bank(seq_len, dt, dj):
    # TODO(synk): exact per-scale filter truncation of wavelets_pytorch's
    # WaveletTransformTorch is not reproduced; full-length dense Morlet filters
    # (same CWT definition) are used, followed by |W|^2.
    s0 = 2.0 * dt
    J = int(np.floor((1.0 / dj) * np.log2(seq_len * dt / s0)))
    scales = s0 * 2.0 ** (dj * np.arange(J + 1))
    n_scales = len(scales)
    k = np.arange(seq_len)
    diff = (k[None, :] - k[:, None]) * dt                        # (n_out, k_in)
    eta = diff[None, :, :] / scales[:, None, None]               # (S, n, k)
    norm = (np.pi ** -0.25) * np.sqrt(dt / scales)[:, None, None]
    gauss = np.exp(-0.5 * eta ** 2)
    fr = norm * np.cos(_W0 * eta) * gauss
    fi = norm * np.sin(_W0 * eta) * gauss
    # column index = s * seq_len + n_out ; contraction over k_in
    filt_r = np.transpose(fr, (2, 0, 1)).reshape(seq_len, n_scales * seq_len)
    filt_i = np.transpose(fi, (2, 0, 1)).reshape(seq_len, n_scales * seq_len)
    sp = n_scales * seq_len
    spp = ((sp + 127) // 128) * 128                              # pad cols to mult of 128
    if spp != sp:
        filt_r = np.pad(filt_r, ((0, 0), (0, spp - sp)))
        filt_i = np.pad(filt_i, ((0, 0), (0, spp - sp)))
    col_tile = 128
    for t in range(min(spp, 1024), 127, -128):                   # largest dividing tile <=1024
        if spp % t == 0:
            col_tile = t
            break
    return (jnp.asarray(filt_r, jnp.bfloat16),
            jnp.asarray(filt_i, jnp.bfloat16), n_scales, col_tile)


# ------------------------------------------------------------------
# Forward pass
# ------------------------------------------------------------------

def resnet_forward(params, X):
    N, C, L = X.shape

    # self.standardize = BatchNorm1d(channels): stats-only pass (no copy of X written).
    st_rows = row_stats(X.reshape(N * C, L))                     # (N*C, 2) [sum, sumsq]
    st_std = st_rows.reshape(N, C, 2).sum(axis=0).T              # (2, C)
    sc_std, sh_std = bn_scale_shift(st_std, params['std_g'], params['std_b'], N * L)

    # self.wt.power(standardize(X)) — standardize fused as a per-row affine prologue.
    row_sc = jnp.tile(sc_std, N).reshape(N * C, 1)
    row_sh = jnp.tile(sh_std, N).reshape(N * C, 1)
    power = wavelet_power(X.reshape(N * C, L).astype(jnp.float32),
                          row_sc, row_sh, params['filt_r'], params['filt_i'],
                          params['wt_col_tile'])
    S = params['n_scales']
    img = power[:, :S * L].reshape(N, C, S, L).transpose(0, 2, 3, 1)   # NHWC (N, S, L, C)

    # stem: Conv2d(k, s) + BN + ReLU (conv emits stats; BN-apply emits next-BN stats)
    ks = params['ksize']
    y, st0, (H, W) = conv2d(img.reshape(N, S * L, C), (S, L),
                            params['w0'], params['w0_meta'],
                            ksize=ks, stride=params['stride'], pad=ks // 2)
    Ch = y.shape[-1]
    sc0, sh0 = bn_scale_shift(st0, params['bn0_g'], params['bn0_b'], N * H * W)
    h2, h_stat = bn_apply(y.reshape(N * H * W, Ch), sc0, sh0, relu=True)
    h = h2.reshape(N, H * W, Ch)

    # 8 full-preactivation residual units
    units = params['units']
    for idx, u in enumerate(units):
        stride = u['stride']
        last = idx == len(units) - 1
        s1, b1 = bn_scale_shift(h_stat, u['bn1_g'], u['bn1_b'], N * H * W)

        # BN1+ReLU fused into conv1's prologue (stride-1 and strided/s2d alike).
        r1, r1_st, (H1, W1) = conv2d(h, (H, W), u['w1'], u['w1_meta'],
                                     ksize=3, stride=stride, pad=1, prologue=(s1, b1))
        Cout = r1.shape[-1]
        s2, b2 = bn_scale_shift(r1_st, u['bn2_g'], u['bn2_b'], N * H1 * W1)

        # skip path on raw h (matches reference: skip(X), not pre-activated)
        if 'wskip' in u:
            h_img = h.reshape(N, H, W, Ch)
            h_sub = h_img[:, ::stride, ::stride, :]
            Hs, Ws = h_sub.shape[1], h_sub.shape[2]
            res, _, _ = conv2d(h_sub.reshape(N, Hs * Ws, Ch), (Hs, Ws),
                               u['wskip'], u['wskip_meta'],
                               ksize=1, stride=1, pad=0, emit_stats=False)
        else:
            res = h

        # conv2 with BN2+ReLU prologue and fused residual add (+ stats of the new h).
        h, h_stat, (H, W) = conv2d(r1, (H1, W1), u['w2'], u['w2_meta'],
                                   ksize=3, stride=1, pad=1,
                                   prologue=(s2, b2), res=res,
                                   emit_stats=not last)
        Ch = Cout

    # AdaptiveAvgPool2d(1) + Flatten + Linear (fused)
    return head(h, params['fc_wT'], params['fc_b'])


# ------------------------------------------------------------------
# Deterministic parameter init (weights packed / cast once, hoisted)
# ------------------------------------------------------------------

def init_params(key, channels, conv_filters, kernel_size, stride, n_classes,
                seq_len, dt, dj):
    keys = iter(jax.random.split(key, 128))

    def nrm(shape, scale=0.05):
        return scale * jax.random.normal(next(keys), shape, jnp.float32)

    def gamma(shape):
        return 1.0 + 0.1 * jax.random.normal(next(keys), shape, jnp.float32)

    filt_r, filt_i, n_scales, col_tile = morlet_filter_bank(seq_len, dt, dj)

    w0 = nrm((conv_filters, channels, kernel_size, kernel_size))
    w0p, w0m = pack_conv(w0, stride)
    p = {
        'std_g': gamma((channels,)),
        'std_b': nrm((channels,), 0.1),
        'filt_r': filt_r, 'filt_i': filt_i, 'n_scales': n_scales,
        'wt_col_tile': col_tile,
        'ksize': kernel_size, 'stride': stride,
        'w0': w0p, 'w0_meta': w0m,
        'bn0_g': gamma((conv_filters,)),
        'bn0_b': nrm((conv_filters,), 0.1),
    }
    units = []
    res_blocks = 4
    for i in range(res_blocks):
        for st in ((1 if i == 0 else 2), 1):
            ch = conv_filters * 2 ** i
            in_ch = ch // st
            w1 = nrm((ch, in_ch, 3, 3))
            w2 = nrm((ch, ch, 3, 3))
            w1p, w1m = pack_conv(w1, st)
            w2p, w2m = pack_conv(w2, 1)
            u = {
                'stride': st,
                'bn1_g': gamma((in_ch,)), 'bn1_b': nrm((in_ch,), 0.1),
                'w1': w1p, 'w1_meta': w1m,
                'bn2_g': gamma((ch,)), 'bn2_b': nrm((ch,), 0.1),
                'w2': w2p, 'w2_meta': w2m,
            }
            if in_ch != ch:
                wsk = nrm((ch, in_ch, 1, 1))
                wskp, wskm = pack_conv(wsk, 1)   # stride handled by wrapper subsample
                u['wskip'] = wskp
                u['wskip_meta'] = wskm
            units.append(u)
    p['units'] = units
    cf_final = conv_filters * 2 ** (res_blocks - 1)
    fc_w = nrm((n_classes, cf_final))
    p['fc_wT'] = jnp.transpose(fc_w, (1, 0))                    # (Cf, n_classes), hoisted
    p['fc_b'] = nrm((n_classes,)).reshape(1, n_classes)
    return p


if __name__ == "__main__":
    batch, channels, seq_len = 2, 4, 32
    conv_filters, kernel_size, stride, n_classes = 8, 7, 2, 1
    dt, dj = 0.005, 0.125

    key = jax.random.PRNGKey(0)
    k_x, k_p = jax.random.split(key)
    X = jax.random.normal(k_x, (batch, channels, seq_len), jnp.float32)
    params = init_params(k_p, channels, conv_filters, kernel_size, stride,
                         n_classes, seq_len, dt, dj)

    logits = resnet_forward(params, X)
    logits = jax.block_until_ready(logits)

    assert logits.shape == (batch, n_classes), logits.shape
    assert bool(jnp.all(jnp.isfinite(logits)))
    print("KERNEL_OK")
</pallas_src>

<mosaic_0001>
module attributes {stable_mosaic.version = 11 : i64} {
  func.func @_rowstats_kernel(%arg0: memref<8x32xf32, #tpu.memory_space<vmem>>, %arg1: memref<8x2xf32, #tpu.memory_space<vmem>>) attributes {dimension_semantics = [], scalar_prefetch = 0 : i64, scratch_operands = 0 : i64, tpu.core_type = #tpu.core_type<tc>} {
    %c0 = arith.constant 0 : index
    %c0_0 = arith.constant 0 : index
    %0 = vector.load %arg0[%c0, %c0_0] : memref<8x32xf32, #tpu.memory_space<vmem>>, vector<8x32xf32>
    %cst = arith.constant dense<0.000000e+00> : vector<8xf32>
    %1 = vector.multi_reduction <add>, %0, %cst [1] : vector<8x32xf32> to vector<8xf32>
    %2 = vector.shape_cast %1 : vector<8xf32> to vector<8x1xf32>
    %3 = arith.mulf %0, %0 : vector<8x32xf32>
    %cst_1 = arith.constant dense<0.000000e+00> : vector<8xf32>
    %4 = vector.multi_reduction <add>, %3, %cst_1 [1] : vector<8x32xf32> to vector<8xf32>
    %5 = vector.shape_cast %4 : vector<8xf32> to vector<8x1xf32>
    %6 = tpu.concatenate %2, %5 in 1 : vector<8x1xf32>, vector<8x1xf32> -> vector<8x2xf32>
    %c0_2 = arith.constant 0 : index
    %c0_3 = arith.constant 0 : index
    %7 = vector.load %arg1[%c0_2, %c0_3] : memref<8x2xf32, #tpu.memory_space<vmem>>, vector<8x2xf32>
    tpu.vector_store %arg1[%c0_2, %c0_3], %6 {strides = array<i32>} : memref<8x2xf32, #tpu.memory_space<vmem>>, vector<8x2xf32>,
    return
  }
}

</mosaic_0001>

<bundles_post_ra>
// kernel: tpu_custom_call.1
= control target key start
LH: loop header
LB: loop body
LE: loop exit
PB: predicated region body
PF: predicated region fallthrough
CT: control target
= control target key end

     0   :  { %6 = vsyncpa [#allocation3], 0  ;;  %s67_s9 = smov [#allocation2]   ;;  %s84_s0 = inlined_call_operand.hbm [shape: f32[8,32], index: 0, kind: input, shape index: {}]   ;;  %s85_s1 = inlined_call_operand.vmem [shape: f32[8,2], index: 1, kind: output, shape index: {}]  }
   0x1   :  { %s12_s8 = sshll.u32 %s84_s0, 4  ;;  %s14_s10 = sshll.u32 %s67_s9, 4  ;;  %s13_s8 = int_to_ptr.hbm [resolvable:$true] %s12_s8  ;;  %s15_s10 = int_to_ptr.vmem [resolvable:$true] %s14_s10 }
   0x2   :  { %17 = dma.hbm_to_vmem [thread:$0]  %s13_s8, 128, %s15_s10, [#allocation3]  }
   0x3   :  { %65 = dma.done.wait [#allocation3], 128  }
   0x4   :  { %66 = vsyncadd [#allocation3], 4294967168  ;;  %vm23_vm0 = vcmask 261120   ;;  %v22_v0 = vld [vmem:[#allocation2] sm:$0xff]  ;;  %vm31_vm1 = vcmask 7168   ;;  %vm33_vm2 = vcmask 15360  }
   0x5   :  { %v24_v1 = vsel %vm23_vm0, %v22_v0, 0.0  ;;  %v27_v2 = vmul.f32 %v22_v0, %v22_v0 }
   0x6   :  { %25 = vadd.xlane.f32.xlu0 %v24_v1 }
   0x7   :  { %v28_v3 = vsel %vm23_vm0, %v27_v2, 0.0 }
   0xe   :  { %29 = vadd.xlane.f32.xlu0 %v28_v3 }
  0x79   :  { %v26_v4 = vpop.xlane.xlu0 %25 }
  0x81   :  { %v30_v5 = vpop.xlane.xlu0 %29 }
  0x82   :  { %v32_v6 = vsel %vm31_vm1, %v26_v4, %v30_v5 }
  0x83   :  { %34 = vst.msk [vmem:[%s85_s1] sm:$0xff] %vm33_vm2, %v32_v6 }
  0x84   :  { %39 = vsyncpa [#allocation3], 1 }

</bundles_post_ra>
